<compile_context>
chip_gen: v5e
topology: v5e:2x2
jax: 0.10.0
libtpu: 0.0.40
codegen_flags: <defaults>
</compile_context>

<pallas_src>
import jax
import jax.numpy as jnp
from jax.experimental import pallas as pl
from jax.experimental.pallas import tpu as pltpu

IN_DIM = 28 * 28   # 784
HID_DIM = 128
OUT_DIM = 10
OUT_PAD = 128      # padded layer-2 width so the second MXU matmul is aligned
TILE_B = 2048      # max batch tile (per-step overhead well amortized)


def _round_up(x, m):
    return ((x + m - 1) // m) * m


def mlp_kernel(x_ref, w1_ref, b1_ref, w2_ref, b2_ref, o_ref):
    # x_ref:  (tb, 784)  f32      w1_ref: (784, 128) bf16   b1_ref: (1, 128) f32
    # w2_ref: (128, 128) bf16     b2_ref: (1, 128)   f32    o_ref:  (tb, 10) f32
    x = x_ref[...].astype(jnp.bfloat16)        # in-kernel cast; HBM x stays f32
    # Layer 1: x @ W1 + b1, ReLU.  bf16 MXU, f32 accumulation, f32 epilogue.
    h = jnp.dot(x, w1_ref[...], preferred_element_type=jnp.float32)
    h = jnp.maximum(h + b1_ref[...], 0.0)
    # Layer 2: h @ W2pad + b2pad (columns 10..127 are zero).  Only the real
    # 10 logits are stored (masked store; writeback ~12x smaller than 128-wide).
    y = jnp.dot(h.astype(w2_ref.dtype), w2_ref[...],
                preferred_element_type=jnp.float32)
    y = y + b2_ref[...]
    o_ref[...] = y[:, :OUT_DIM].astype(o_ref.dtype)


def _choose_tile(batch):
    """8-aligned batch tile; aims for >=2 grid steps (v7x has 2 TensorCores)."""
    b8 = _round_up(batch, 8)
    half = _round_up(pl.cdiv(b8, 2), 8)
    return max(8, min(TILE_B, half))


@jax.jit
def simple_mlp(x_nchw, w1, b1, w2, b2):
    """x_nchw: (B, 1, 28, 28) float32. Returns (B, 10) float32.

    w1: (784, 128), b1: (1, 128), w2: (128, 10), b2: (1, 10) -- stored as
    (in, out), equivalent to PyTorch's x @ W.T with its (out, in) layout.
    """
    B = x_nchw.shape[0]
    x2d = x_nchw.reshape(B, -1).astype(jnp.float32)   # nn.Flatten (row-major)
    assert x2d.shape[1] == IN_DIM

    tb = _choose_tile(B)
    grid = pl.cdiv(B, tb)                             # ragged last block OK

    # Weights: bf16 for the MXU; layer-2 weight/bias zero-padded 10 -> 128 so
    # the second matmul is lane-aligned (tiny, VMEM-resident). Biases stay f32.
    w1_bf16 = w1.astype(jnp.bfloat16)
    w2_pad = jnp.pad(w2, ((0, 0), (0, OUT_PAD - OUT_DIM))).astype(jnp.bfloat16)
    b1_f32 = b1.astype(jnp.float32).reshape(1, HID_DIM)
    b2_pad = jnp.pad(b2.astype(jnp.float32).reshape(1, OUT_DIM),
                     ((0, 0), (0, OUT_PAD - OUT_DIM)))

    return pl.pallas_call(
        mlp_kernel,
        out_shape=jax.ShapeDtypeStruct((B, OUT_DIM), jnp.float32),
        grid_spec=pl.GridSpec(
            grid=(grid,),
            in_specs=[
                pl.BlockSpec((tb, IN_DIM), lambda i: (i, 0)),        # x tile (streamed, f32)
                pl.BlockSpec((IN_DIM, HID_DIM), lambda i: (0, 0)),   # W1 (resident)
                pl.BlockSpec((1, HID_DIM), lambda i: (0, 0)),        # b1 (resident)
                pl.BlockSpec((HID_DIM, OUT_PAD), lambda i: (0, 0)),  # W2 (resident)
                pl.BlockSpec((1, OUT_PAD), lambda i: (0, 0)),        # b2 (resident)
            ],
            out_specs=pl.BlockSpec((tb, OUT_DIM), lambda i: (i, 0)), # narrow logits
        ),
        compiler_params=pltpu.CompilerParams(
            # Independent batch tiles -> shardable across TCs on v7x.
            dimension_semantics=("parallel",),
            # tb=2048: ~15 MiB (double-buffered f32 x tiles + lane-padded out
            # buffers) — above v5e's 16 MiB default scoped limit, well within
            # physical VMEM on v5e/v6e and v7x's 64 MiB.
            vmem_limit_bytes=32 * 1024 * 1024,
        ),
    )(x2d, w1_bf16, b1_f32, w2_pad, b2_pad)


def init_params(key):
    """Deterministic init matching the PyTorch layer shapes.
    Weights stored as (in, out); biases as (1, out) for lane-friendly bcast."""
    k1, k2, k3, k4 = jax.random.split(key, 4)
    # nn.Linear default init bounds: U(-1/sqrt(fan_in), +1/sqrt(fan_in))
    bound1 = 1.0 / jnp.sqrt(IN_DIM)
    bound2 = 1.0 / jnp.sqrt(HID_DIM)
    w1 = jax.random.uniform(k1, (IN_DIM, HID_DIM), jnp.float32, -bound1, bound1)
    b1 = jax.random.uniform(k2, (1, HID_DIM), jnp.float32, -bound1, bound1)
    w2 = jax.random.uniform(k3, (HID_DIM, OUT_DIM), jnp.float32, -bound2, bound2)
    b2 = jax.random.uniform(k4, (1, OUT_DIM), jnp.float32, -bound2, bound2)
    return w1, b1, w2, b2


if __name__ == "__main__":
    key = jax.random.PRNGKey(0)
    k_in, k_in2, k_par = jax.random.split(key, 3)

    w1, b1, w2, b2 = init_params(k_par)

    def ref_fn(x):  # plain f32 JAX reference (same math path as PyTorch forward)
        b = x.shape[0]
        return jnp.maximum(x.reshape(b, -1) @ w1 + b1, 0.0) @ w2 + b2

    # Small, 8-aligned batch (single tile).
    B = 8
    x = jax.random.normal(k_in, (B, 1, 28, 28), jnp.float32)  # NCHW, MNIST-like
    out = jax.block_until_ready(simple_mlp(x, w1, b1, w2, b2))
    assert out.shape == (B, OUT_DIM)
    # Tolerance accounts for bf16 x/W on the MXU (accumulation stays f32).
    assert jnp.allclose(out, ref_fn(x), atol=3e-2, rtol=3e-2)

    # Non-multiple-of-8 batch: exercises the ragged boundary block (masked writes).
    B2 = 13
    x2 = jax.random.normal(k_in2, (B2, 1, 28, 28), jnp.float32)
    out2 = jax.block_until_ready(simple_mlp(x2, w1, b1, w2, b2))
    assert out2.shape == (B2, OUT_DIM)
    assert jnp.allclose(out2, ref_fn(x2), atol=3e-2, rtol=3e-2)

    print("KERNEL_OK")
</pallas_src>

<mosaic_0001>
module attributes {stable_mosaic.version = 11 : i64} {
  func.func @mlp_kernel(%arg0: i32, %arg1: memref<8x784xf32, #tpu.memory_space<vmem>>, %arg2: memref<784x128xbf16, #tpu.memory_space<vmem>>, %arg3: memref<1x128xf32, #tpu.memory_space<vmem>>, %arg4: memref<128x128xbf16, #tpu.memory_space<vmem>>, %arg5: memref<1x128xf32, #tpu.memory_space<vmem>>, %arg6: memref<8x10xf32, #tpu.memory_space<vmem>>) attributes {dimension_semantics = [#tpu.dimension_semantics<parallel>], iteration_bounds = array<i64: 1>, scalar_prefetch = 0 : i64, scratch_operands = 0 : i64, tpu.core_type = #tpu.core_type<tc>, window_params = [{transform_indices = @transform_0, window_bounds = array<i64: 8, 784>}, {pipeline_mode = #tpu.pipeline_mode<synchronous>, transform_indices = @transform_1, window_bounds = array<i64: 784, 128>}, {pipeline_mode = #tpu.pipeline_mode<synchronous>, transform_indices = @transform_2, window_bounds = array<i64: 1, 128>}, {pipeline_mode = #tpu.pipeline_mode<synchronous>, transform_indices = @transform_3, window_bounds = array<i64: 128, 128>}, {pipeline_mode = #tpu.pipeline_mode<synchronous>, transform_indices = @transform_4, window_bounds = array<i64: 1, 128>}, {transform_indices = @transform_5, window_bounds = array<i64: 8, 10>}]} {
    %c0 = arith.constant 0 : index
    %c0_0 = arith.constant 0 : index
    %0 = vector.load %arg1[%c0, %c0_0] : memref<8x784xf32, #tpu.memory_space<vmem>>, vector<8x784xf32>
    %1 = arith.truncf %0 : vector<8x784xf32> to vector<8x784xbf16>
    %c0_1 = arith.constant 0 : index
    %c0_2 = arith.constant 0 : index
    %2 = vector.load %arg2[%c0_1, %c0_2] : memref<784x128xbf16, #tpu.memory_space<vmem>>, vector<784x128xbf16>
    %cst = arith.constant dense<0.000000e+00> : vector<8x128xf32>
    %3 = tpu.matmul %1, %2, %cst {dimension_numbers = #tpu.dot_dimension_numbers<[1], [0], [0], [1], [0, 0, 1, 1], [], []>} : vector<8x784xbf16>, vector<784x128xbf16>, vector<8x128xf32> -> vector<8x128xf32>
    %c0_3 = arith.constant 0 : index
    %c0_4 = arith.constant 0 : index
    %4 = vector.load %arg3[%c0_3, %c0_4] : memref<1x128xf32, #tpu.memory_space<vmem>>, vector<1x128xf32>
    %5 = vector.broadcast %4 : vector<1x128xf32> to vector<8x128xf32>
    %6 = arith.addf %3, %5 : vector<8x128xf32>
    %cst_5 = arith.constant 0.000000e+00 : f32
    %7 = vector.broadcast %cst_5 : f32 to vector<8x128xf32>
    %8 = arith.maximumf %6, %7 : vector<8x128xf32>
    %9 = arith.truncf %8 : vector<8x128xf32> to vector<8x128xbf16>
    %c0_6 = arith.constant 0 : index
    %c0_7 = arith.constant 0 : index
    %10 = vector.load %arg4[%c0_6, %c0_7] : memref<128x128xbf16, #tpu.memory_space<vmem>>, vector<128x128xbf16>
    %cst_8 = arith.constant dense<0.000000e+00> : vector<8x128xf32>
    %11 = tpu.matmul %9, %10, %cst_8 {dimension_numbers = #tpu.dot_dimension_numbers<[1], [0], [0], [1], [0, 0, 1, 1], [], []>} : vector<8x128xbf16>, vector<128x128xbf16>, vector<8x128xf32> -> vector<8x128xf32>
    %c0_9 = arith.constant 0 : index
    %c0_10 = arith.constant 0 : index
    %12 = vector.load %arg5[%c0_9, %c0_10] : memref<1x128xf32, #tpu.memory_space<vmem>>, vector<1x128xf32>
    %13 = vector.broadcast %12 : vector<1x128xf32> to vector<8x128xf32>
    %14 = arith.addf %11, %13 : vector<8x128xf32>
    %15 = vector.extract_strided_slice %14 {offsets = [0, 0], sizes = [8, 10], strides = [1, 1]} : vector<8x128xf32> to vector<8x10xf32>
    %c0_11 = arith.constant 0 : index
    %c0_12 = arith.constant 0 : index
    %16 = vector.load %arg6[%c0_11, %c0_12] : memref<8x10xf32, #tpu.memory_space<vmem>>, vector<8x10xf32>
    tpu.vector_store %arg6[%c0_11, %c0_12], %15 {strides = array<i32>} : memref<8x10xf32, #tpu.memory_space<vmem>>, vector<8x10xf32>,
    return
  }
  func.func @transform_0(%arg0: i32) -> (i32, i32) {
    %c0_i32 = arith.constant 0 : i32
    %c0_i32_0 = arith.constant 0 : i32
    return %arg0, %c0_i32 : i32, i32
  }
  func.func @transform_1(%arg0: i32) -> (i32, i32) {
    %c0_i32 = arith.constant 0 : i32
    %c0_i32_0 = arith.constant 0 : i32
    %c0_i32_1 = arith.constant 0 : i32
    return %c0_i32, %c0_i32_0 : i32, i32
  }
  func.func @transform_2(%arg0: i32) -> (i32, i32) {
    %c0_i32 = arith.constant 0 : i32
    %c0_i32_0 = arith.constant 0 : i32
    %c0_i32_1 = arith.constant 0 : i32
    return %c0_i32, %c0_i32_0 : i32, i32
  }
  func.func @transform_3(%arg0: i32) -> (i32, i32) {
    %c0_i32 = arith.constant 0 : i32
    %c0_i32_0 = arith.constant 0 : i32
    %c0_i32_1 = arith.constant 0 : i32
    return %c0_i32, %c0_i32_0 : i32, i32
  }
  func.func @transform_4(%arg0: i32) -> (i32, i32) {
    %c0_i32 = arith.constant 0 : i32
    %c0_i32_0 = arith.constant 0 : i32
    %c0_i32_1 = arith.constant 0 : i32
    return %c0_i32, %c0_i32_0 : i32, i32
  }
  func.func @transform_5(%arg0: i32) -> (i32, i32) {
    %c0_i32 = arith.constant 0 : i32
    %c0_i32_0 = arith.constant 0 : i32
    return %arg0, %c0_i32 : i32, i32
  }
}

</mosaic_0001>

<bundles_post_ra>
// kernel: simple_mlp.1
= control target key start
LH: loop header
LB: loop body
LE: loop exit
PB: predicated region body
PF: predicated region fallthrough
CT: control target
= control target key end

     0   :  { %s1175_s0 = inlined_call_operand.vmem [shape: f32[8,784], index: 0, kind: input, shape index: {}]   ;;  %s1176_s1 = inlined_call_operand.vmem [shape: bf16[784,128], index: 1, kind: input, shape index: {}]   ;;  %s1177_s2 = inlined_call_operand.vmem [shape: f32[1,128], index: 2, kind: input, shape index: {}]   ;;  %s1178_s3 = inlined_call_operand.vmem [shape: bf16[128,128], index: 3, kind: input, shape index: {}]   ;;  %s1179_s4 = inlined_call_operand.vmem [shape: f32[1,128], index: 4, kind: input, shape index: {}]   ;;  %s1180_s5 = inlined_call_operand.hbm [shape: f32[8,10], index: 5, kind: output, shape index: {}]  }
   0x1   :  { %v864_v0 = vld [vmem:[%s1176_s1 + $0x38] sm:$0xff]  ;;  %v863_v3 = vld [vmem:[%s1176_s1 + $0x30] sm:$0xff]  ;;  %v862_v8 = vld [vmem:[%s1176_s1 + $0x28] sm:$0xff] }
   0x2   :  { %v872_v1 = vld [vmem:[%s1176_s1 + $0x78] sm:$0xff]  ;;  %436 = vmatpush.bf16.msra.mxu0 %v864_v0  ;;  %v871_v4 = vld [vmem:[%s1176_s1 + $0x70] sm:$0xff]  ;;  %v870_v9 = vld [vmem:[%s1176_s1 + $0x68] sm:$0xff] }
   0x3   :  { %v880_v2 = vld [vmem:[%s1176_s1 + $0xb8] sm:$0xff]  ;;  %449 = vmatpush.bf16.msra.mxu1 %v872_v1  ;;  %v879_v5 = vld [vmem:[%s1176_s1 + $0xb0] sm:$0xff]  ;;  %v878_v10 = vld [vmem:[%s1176_s1 + $0xa8] sm:$0xff] }
   0x4   :  { %462 = vmatpush.bf16.msra.mxu2 %v880_v2  ;;  %v888_v6 = vld [vmem:[%s1176_s1 + $0xf8] sm:$0xff]  ;;  %v887_v7 = vld [vmem:[%s1176_s1 + $0xf0] sm:$0xff]  ;;  %v886_v11 = vld [vmem:[%s1176_s1 + $0xe8] sm:$0xff] }
   0x5   :  { %475 = vmatpush.bf16.msra.mxu3 %v888_v6  ;;  %v861_v12 = vld [vmem:[%s1176_s1 + $0x20] sm:$0xff]  ;;  %v860_v16 = vld [vmem:[%s1176_s1 + $0x18] sm:$0xff] }
   0x6   :  { %437 = vmatpush.bf16.msra.mxu0 %v863_v3  ;;  %v869_v13 = vld [vmem:[%s1176_s1 + $0x60] sm:$0xff]  ;;  %v868_v17 = vld [vmem:[%s1176_s1 + $0x58] sm:$0xff] }
   0x7   :  { %450 = vmatpush.bf16.msra.mxu1 %v871_v4  ;;  %v877_v14 = vld [vmem:[%s1176_s1 + $0xa0] sm:$0xff]  ;;  %v876_v18 = vld [vmem:[%s1176_s1 + $0x98] sm:$0xff] }
   0x8   :  { %463 = vmatpush.bf16.msra.mxu2 %v879_v5  ;;  %v885_v15 = vld [vmem:[%s1176_s1 + $0xe0] sm:$0xff] }
   0x9   :  { %476 = vmatpush.bf16.msra.mxu3 %v887_v7 }
   0xa   :  { %438 = vmatpush.bf16.msra.mxu0 %v862_v8 }
   0xb   :  { %451 = vmatpush.bf16.msra.mxu1 %v870_v9 }
   0xc   :  { %464 = vmatpush.bf16.msra.mxu2 %v878_v10 }
   0xd   :  { %477 = vmatpush.bf16.msra.mxu3 %v886_v11 }
   0xe   :  { %439 = vmatpush.bf16.msra.mxu0 %v861_v12 }
   0xf   :  { %452 = vmatpush.bf16.msra.mxu1 %v869_v13 }
  0x10   :  { %465 = vmatpush.bf16.msra.mxu2 %v877_v14 }
  0x11   :  { %10 = vsyncpa [#allocation3], 0  ;;  %478 = vmatpush.bf16.msra.mxu3 %v885_v15  ;;  %v884_v19 = vld [vmem:[%s1176_s1 + $0xd8] sm:$0xff]  ;;  %v859_v20 = vld [vmem:[%s1176_s1 + $0x10] sm:$0xff]  ;;  %vm432_vm0 = vcmask 130048   ;;  %s943_s21 = smov [#allocation2]  }
  0x12   :  { %440 = vmatpush.bf16.msra.mxu0 %v860_v16  ;;  %v867_v21 = vld [vmem:[%s1176_s1 + $0x50] sm:$0xff]  ;;  %v858_v24 = vld [vmem:[%s1176_s1 + $0x8] sm:$0xff]  ;;  %v857_v27 = vld [vmem:[%s1176_s1] sm:$0xff]  ;;  %s617_s22 = sshll.u32 %s943_s21, 4  ;;  %s619_s25 = sshll.u32 %s1180_s5, 4  ;;  %vm610_vm1 = vcmask 80896   ;;  %s618_s22 = int_to_ptr.vmem [resolvable:$true] %s617_s22  ;;  %s620_s25 = int_to_ptr.hbm [resolvable:$true] %s619_s25 }
  0x13   :  { %453 = vmatpush.bf16.msra.mxu1 %v868_v17  ;;  %v875_v22 = vld [vmem:[%s1176_s1 + $0x90] sm:$0xff]  ;;  %v866_v25 = vld [vmem:[%s1176_s1 + $0x48] sm:$0xff]  ;;  %v865_v29 = vld [vmem:[%s1176_s1 + $0x40] sm:$0xff] }
  0x14   :  { %466 = vmatpush.bf16.msra.mxu2 %v876_v18  ;;  %v883_v23 = vld [vmem:[%s1176_s1 + $0xd0] sm:$0xff]  ;;  %v874_v26 = vld [vmem:[%s1176_s1 + $0x88] sm:$0xff]  ;;  %v22_v30 = vld [vmem:[%s1175_s0] sm:$0xff] }
  0x15   :  { %479 = vmatpush.bf16.msra.mxu3 %v884_v19  ;;  %v882_v28 = vld [vmem:[%s1176_s1 + $0xc8] sm:$0xff]  ;;  %v896_v32 = vld [vmem:[%s1176_s1 + $0x138] sm:$0xff]  ;;  %v873_v34 = vld [vmem:[%s1176_s1 + $0x80] sm:$0xff]  ;;  %v29_v36 = vpack.c.bf16 %v22_v30, %v22_v30 }
  0x16   :  { %441 = vmatpush.bf16.msra.mxu0 %v859_v20  ;;  %v23_v31 = vld [vmem:[%s1175_s0 + $0x8] sm:$0xff]  ;;  %v904_v33 = vld [vmem:[%s1176_s1 + $0x178] sm:$0xff]  ;;  %v24_v35 = vld [vmem:[%s1175_s0 + $0x10] sm:$0xff] }
  0x17   :  { %454 = vmatpush.bf16.msra.mxu1 %v867_v21  ;;  %v30_v37 = vpack.c.bf16 %v23_v31, %v23_v31  ;;  %v881_v38 = vld [vmem:[%s1176_s1 + $0xc0] sm:$0xff]  ;;  %v25_v40 = vld [vmem:[%s1175_s0 + $0x18] sm:$0xff]  ;;  %v895_v41 = vld [vmem:[%s1176_s1 + $0x130] sm:$0xff]  ;;  %v31_v43 = vpack.c.bf16 %v24_v35, %v24_v35 }
  0x18   :  { %467 = vmatpush.bf16.msra.mxu2 %v875_v22  ;;  %v905_v39 = vld [vmem:[%s1176_s1 + $0x180] sm:$0xff]  ;;  %v903_v42 = vld [vmem:[%s1176_s1 + $0x170] sm:$0xff]  ;;  %v32_v44 = vpack.c.bf16 %v25_v40, %v25_v40  ;;  %v894_v45 = vld [vmem:[%s1176_s1 + $0x128] sm:$0xff] }
  0x19   :  { %480 = vmatpush.bf16.msra.mxu3 %v883_v23  ;;  %v902_v46 = vld [vmem:[%s1176_s1 + $0x168] sm:$0xff]  ;;  %v893_v47 = vld [vmem:[%s1176_s1 + $0x120] sm:$0xff]  ;;  %v892_v49 = vld [vmem:[%s1176_s1 + $0x118] sm:$0xff] }
  0x1a   :  { %442 = vmatpush.bf16.msra.mxu0 %v858_v24  ;;  %v901_v48 = vld [vmem:[%s1176_s1 + $0x160] sm:$0xff]  ;;  %v900_v50 = vld [vmem:[%s1176_s1 + $0x158] sm:$0xff]  ;;  %v28_v51 = vld [vmem:[%s1175_s0 + $0x30] sm:$0xff] }
  0x1b   :  { %455 = vmatpush.bf16.msra.mxu1 %v866_v25  ;;  %v891_v52 = vld [vmem:[%s1176_s1 + $0x110] sm:$0xff]  ;;  %v35_v54 = vpack.c.bf16 %v28_v51, %v28_v51  ;;  %v890_v55 = vld [vmem:[%s1176_s1 + $0x108] sm:$0xff]  ;;  %v889_v57 = vld [vmem:[%s1176_s1 + $0x100] sm:$0xff] }
  0x1c   :  { %468 = vmatpush.bf16.msra.mxu2 %v874_v26  ;;  %v899_v53 = vld [vmem:[%s1176_s1 + $0x150] sm:$0xff]  ;;  %v898_v56 = vld [vmem:[%s1176_s1 + $0x148] sm:$0xff]  ;;  %v897_v58 = vld [vmem:[%s1176_s1 + $0x140] sm:$0xff] }
  0x1d   :  { %481 = vmatpush.bf16.msra.mxu3 %v882_v28  ;;  %v26_v59 = vld [vmem:[%s1175_s0 + $0x20] sm:$0xff]  ;;  %v27_v60 = vld [vmem:[%s1175_s0 + $0x28] sm:$0xff]  ;;  %v913_v63 = vld [vmem:[%s1178_s3 + $0x38] sm:$0xff] }
  0x1e   :  { %443 = vmatpush.bf16.msra.mxu0 %v857_v27  ;;  %v33_v61 = vpack.c.bf16 %v26_v59, %v26_v59  ;;  %v34_v62 = vpack.c.bf16 %v27_v60, %v27_v60  ;;  %v912_v0 = vld [vmem:[%s1178_s3 + $0x30] sm:$0xff]  ;;  %v911_v1 = vld [vmem:[%s1178_s3 + $0x28] sm:$0xff]  ;;  %v910_v2 = vld [vmem:[%s1178_s3 + $0x20] sm:$0xff] }
  0x1f   :  { %456 = vmatpush.bf16.msra.mxu1 %v865_v29  ;;  %v909_v3 = vld [vmem:[%s1178_s3 + $0x18] sm:$0xff]  ;;  %v908_v4 = vld [vmem:[%s1178_s3 + $0x10] sm:$0xff]  ;;  %v907_v5 = vld [vmem:[%s1178_s3 + $0x8] sm:$0xff] }
  0x20   :  { %469 = vmatpush.bf16.msra.mxu2 %v873_v34  ;;  %v906_v8 = vld [vmem:[%s1178_s3] sm:$0xff] }
  0x21   :  { %444 = vmatmul.bf16.vlgmr.msra.gmra.mxu0 %v29_v36  ;;  %482 = vmatpush.bf16.msra.mxu3 %v881_v38  ;;  %v915_v13 = vld [vmem:[%s1177_s2] ss:$0 sm:$0xff] }
  0x22   :  { %488 = vmatpush.bf16.msrb.mxu0 %v896_v32  ;;  %457 = vmatmul.bf16.vlgmr.msra.gmra.mxu1 %v30_v37  ;;  %v916_v31 = vld [vmem:[%s1179_s4] ss:$0 sm:$0xff] }
  0x23   :  { %501 = vmatpush.bf16.msrb.mxu1 %v904_v33  ;;  %470 = vmatmul.bf16.vlgmr.msra.gmra.mxu2 %v31_v43 }
  0x24   :  { %521 = vmatpush.bf16.msrb.mxu2 %v905_v39  ;;  %483 = vmatmul.bf16.vlgmr.msra.gmra.mxu3 %v32_v44 }
  0x25   :  { %597 = vmatpush.bf16.msrb.mxu3 %v913_v63 }
  0x26   :  { %489 = vmatpush.bf16.msrb.mxu0 %v895_v41 }
  0x27   :  { %502 = vmatpush.bf16.msrb.mxu1 %v903_v42 }
  0x29   :  { %598 = vmatpush.bf16.msrb.mxu3 %v912_v0 }
  0x2a   :  { %490 = vmatpush.bf16.msrb.mxu0 %v894_v45 }
  0x2b   :  { %503 = vmatpush.bf16.msrb.mxu1 %v902_v46 }
  0x2d   :  { %599 = vmatpush.bf16.msrb.mxu3 %v911_v1 }
  0x2e   :  { %491 = vmatpush.bf16.msrb.mxu0 %v893_v47 }
  0x2f   :  { %504 = vmatpush.bf16.msrb.mxu1 %v901_v48 }
  0x31   :  { %600 = vmatpush.bf16.msrb.mxu3 %v910_v2 }
  0x32   :  { %492 = vmatpush.bf16.msrb.mxu0 %v892_v49 }
  0x33   :  { %505 = vmatpush.bf16.msrb.mxu1 %v900_v50  ;;  %824 = vmatmul.msk.bf16.vlgmr.msrb.gmra.mxu2 %vm432_vm0, %v35_v54 }
  0x35   :  { %601 = vmatpush.bf16.msrb.mxu3 %v909_v3 }
  0x36   :  { %493 = vmatpush.bf16.msrb.mxu0 %v891_v52 }
  0x37   :  { %506 = vmatpush.bf16.msrb.mxu1 %v899_v53 }
  0x39   :  { %602 = vmatpush.bf16.msrb.mxu3 %v908_v4 }
  0x3a   :  { %494 = vmatpush.bf16.msrb.mxu0 %v890_v55 }
  0x3b   :  { %507 = vmatpush.bf16.msrb.mxu1 %v898_v56 }
  0x3d   :  { %603 = vmatpush.bf16.msrb.mxu3 %v907_v5 }
  0x3e   :  { %495 = vmatpush.bf16.msrb.mxu0 %v889_v57 }
  0x3f   :  { %508 = vmatpush.bf16.msrb.mxu1 %v897_v58 }
  0x41   :  { %496 = vmatmul.bf16.vlgmr.msrb.gmra.mxu0 %v33_v61  ;;  %604 = vmatpush.bf16.msrb.mxu3 %v906_v8 }
  0x42   :  { %509 = vmatmul.bf16.vlgmr.msrb.gmra.mxu1 %v34_v62 }
  0x9e   :  { %v445_v6 = vpop.f32.mrf.mxu0 }
  0x9f   :  { %v458_v7 = vpop.f32.mrf.mxu1  ;;  %v446_v14 = vadd.f32 %v915_v13, %v445_v6 }
  0xa1   :  { %v459_v17 = vadd.f32 %v458_v7, %v446_v14 }
  0xa6   :  { %v447_v9 = vpop.f32.mrf.mxu0  ;;  %v471_v11 = vpop.f32.mrf.mxu2 }
  0xa7   :  { %v460_v10 = vpop.f32.mrf.mxu1  ;;  %v484_v12 = vpop.f32.mrf.mxu3  ;;  %v472_v18 = vadd.f32 %v471_v11, %v459_v17 }
  0xa9   :  { %v485_v20 = vadd.f32 %v484_v12, %v472_v18 }
  0xae   :  { %v473_v15 = vpop.f32.mrf.mxu2 }
  0xaf   :  { %v486_v16 = vpop.f32.mrf.mxu3 }
  0xb6   :  { %v523_v19 = vpop.f32.mrf.mxu2 }
  0xbe   :  { %v497_v21 = vpop.f32.mrf.mxu0  ;;  %v525_v25 = vpop.f32.mrf.mxu2 }
  0xbf   :  { %v510_v22 = vpop.f32.mrf.mxu1  ;;  %v498_v23 = vadd.f32 %v497_v21, %v485_v20 }
  0xc1   :  { %v511_v24 = vadd.f32 %v510_v22, %v498_v23 }
  0xc3   :  { %v524_v26 = vadd.f32 %v523_v19, %v511_v24 }
  0xc5   :  { %v527_v27 = vmax.f32 %v524_v26, 0.0 }
  0xc6   :  { %v499_v28 = vpop.f32.mrf.mxu0 }
  0xc7   :  { %v512_v29 = vpop.f32.mrf.mxu1  ;;  %v528_v30 = vpack.c.bf16 %v527_v27, %v527_v27 }
  0xc9   :  { %605 = vmatmul.bf16.vlgmr.msrb.gmra.mxu3 %v528_v30 }
 0x14c   :  { %v606_v32 = vpop.f32.mrf.mxu3 }
 0x14d   :  { %v607_v33 = vadd.f32 %v916_v31, %v606_v32 }
 0x14f   :  { %611 = vst.msk [vmem:[#allocation2] sm:$0xff] %vm610_vm1, %v607_v33 }
 0x150   :  { %622 = dma.vmem_to_hbm [thread:$0]  %s618_s22, 128, %s620_s25, [#allocation3]  }
 0x154   :  { %v608_v34 = vpop.f32.mrf.mxu3 }
 0x155   :  { %941 = dma.done.wait [#allocation3], 128  }
 0x156   :  { %942 = vsyncadd [#allocation3], 4294967168 }
 0x157   :  { %627 = vsyncpa [#allocation3], 1 }

</bundles_post_ra>
